<compile_context>
chip_gen: v7x
topology: tpu7x:2x2x1
jax: 0.10.0
libtpu: 0.0.40
codegen_flags: <defaults>
</compile_context>

<pallas_src>
import functools

import jax
import jax.numpy as jnp
from jax import lax
from jax.experimental import pallas as pl
from jax.experimental.pallas import tpu as pltpu


def _vmem_limit_bytes() -> int:
    """Scoped-VMEM budget: ~75% of physical (48 MiB on v7x, 96 MiB on v5e/v6e)."""
    try:
        phys = int(pltpu.get_tpu_info().vmem_capacity_bytes)
    except Exception:  # query unavailable -> conservative v7x-safe default
        phys = 64 * 1024 * 1024
    return max(32 * 1024 * 1024, int(phys * 3 // 4))


def _pick_tile(n: int, cap: int, align: int) -> int:
    """Largest tile t <= cap with n % t == 0 and (t % align == 0 or t == n)."""
    if n <= cap:
        return n
    for t in range(cap, 0, -1):
        if n % t == 0 and t % align == 0:
            return t
    # TODO(synk): pad the dimension instead of falling back to an untiled block.
    return n


# ----------------------------------------------------------------------------- #
# Kernel 1: fused QKV projection                                                 #
# ----------------------------------------------------------------------------- #
def _qkv_proj_kernel(x_ref, w_ref, o_ref):
    # x block: [Tp, C]; stacked-weight block: [C, Tn]; out block: [Tp, Tn].
    # Operands stay in the caller's dtype (pass bf16 x / weights for full MXU
    # throughput); accumulation is f32 via preferred_element_type.
    o_ref[...] = jnp.dot(x_ref[...], w_ref[...],
                         preferred_element_type=jnp.float32).astype(o_ref.dtype)


# ----------------------------------------------------------------------------- #
# Kernel 2: flash-style causal cosine attention (heads batched per iteration)    #
# ----------------------------------------------------------------------------- #
def _flash_attn_kernel(q_ref, k_ref, v_ref, nu_ref, o_ref,
                       m_sc, l_sc, acc_sc, *,
                       tq: int, tk: int, head_dim: int, lane_dense_out: bool):
    qi = pl.program_id(1)
    ki = pl.program_id(2)

    @pl.when(ki == 0)
    def _init():
        m_sc[...] = jnp.full(m_sc.shape, -jnp.inf, dtype=m_sc.dtype)
        l_sc[...] = jnp.zeros(l_sc.shape, dtype=l_sc.dtype)
        acc_sc[...] = jnp.zeros(acc_sc.shape, dtype=acc_sc.dtype)

    def _update(apply_mask: bool):
        # q already carries tau and the L2 normalization (folded in the wrapper);
        # k / v are pre-normalized, so this loop is pure matmul + online softmax.
        q = q_ref[0]                      # [H, Tq, D]
        k = k_ref[0]                      # [H, Tk, D]
        v = v_ref[0]                      # [H, Tk, D]
        s = jnp.einsum("hqd,hkd->hqk", q, k,
                       preferred_element_type=jnp.float32)     # [H, Tq, Tk] f32
        if apply_mask:                    # only tiles straddling the diagonal
            row = qi * tq + lax.broadcasted_iota(jnp.int32, (tq, tk), 0)
            col = ki * tk + lax.broadcasted_iota(jnp.int32, (tq, tk), 1)
            s = jnp.where((col <= row)[None, :, :], s, -1e30)

        m_prev = m_sc[...]
        m_new = jnp.maximum(m_prev, jnp.max(s, axis=-1, keepdims=True))
        alpha = jnp.exp(m_prev - m_new)
        p = jnp.exp(s - m_new)
        l_sc[...] = alpha * l_sc[...] + jnp.sum(p, axis=-1, keepdims=True)
        acc_sc[...] = alpha * acc_sc[...] + jnp.einsum(
            "hqk,hkd->hqd", p.astype(v.dtype), v,
            preferred_element_type=jnp.float32)
        m_sc[...] = m_new

    row_hi = qi * tq + (tq - 1)                       # last query row of this tile
    col_hi = ki * tk + (tk - 1)                       # last key column of this tile
    needs_compute = (ki * tk) <= row_hi               # any causally-valid entry
    fully_unmasked = col_hi <= (qi * tq)              # strictly below the diagonal

    pl.when(fully_unmasked)(lambda: _update(apply_mask=False))
    pl.when(jnp.logical_and(needs_compute, jnp.logical_not(fully_unmasked)))(
        lambda: _update(apply_mask=True))

    @pl.when(ki == pl.num_programs(2) - 1)
    def _finalize():
        # Exact reciprocal: [H, Tq, 1] is tiny and approx=True (~2^-12 rel err)
        # would be visible against the f32 reference tolerance.
        inv_l = 1.0 / l_sc[...]
        out = acc_sc[...] * (inv_l * nu_ref[0])       # [H, Tq, D] f32
        if lane_dense_out:
            # Lane-dense [Tq, C] store: each head lands on a 128-aligned lane
            # slab, so every store is an unmasked full-lane vst and the wrapper
            # needs no transpose-back HBM round trip.
            n_heads = acc_sc.shape[0]
            for h in range(n_heads):                  # static unroll
                o_ref[0, :, h * head_dim:(h + 1) * head_dim] = (
                    out[h].astype(o_ref.dtype))
        else:
            # Narrow heads (D % 128 != 0): keep the head-major block store; the
            # wrapper transposes back (cheap at these sizes).
            o_ref[0] = out.astype(o_ref.dtype)


# ----------------------------------------------------------------------------- #
# Wrapper                                                                        #
# ----------------------------------------------------------------------------- #
def scaled_cosine_self_attention(x, wq, wk, wv, tau, nu, *,
                                 num_heads: int, eps: float = 1e-8):
    """x: [B, T, C]; wq/wk/wv: [C, C] (y = x @ W); tau/nu: [1].  Returns [B,T,C]."""
    B, T, C = x.shape
    H = num_heads
    assert C % H == 0
    D = C // H
    vmem_limit = _vmem_limit_bytes()

    # ---- 1) Fused QKV projection: [B*T, C] @ [C, 3C] -> [B*T, 3C] ------------- #
    w_qkv = jnp.concatenate([wq, wk, wv], axis=1)             # [C, 3C]
    BT = B * T
    x2 = x.reshape(BT, C)
    Tp = _pick_tile(BT, 256, 8)       # full MXU row tiles even when T is small
    Tn = _pick_tile(3 * C, 512, 128)  # tile stacked weight along 3C (v7x VMEM)
    assert BT % Tp == 0 and (3 * C) % Tn == 0

    qkv = pl.pallas_call(
        _qkv_proj_kernel,
        out_shape=jax.ShapeDtypeStruct((BT, 3 * C), x.dtype),
        grid_spec=pltpu.PrefetchScalarGridSpec(
            num_scalar_prefetch=0,
            grid=(BT // Tp, (3 * C) // Tn),
            in_specs=[
                pl.BlockSpec((Tp, C), lambda t, n: (t, 0)),    # x rows (reused over n)
                pl.BlockSpec((C, Tn), lambda t, n: (0, n)),    # stacked-weight tile
            ],
            out_specs=pl.BlockSpec((Tp, Tn), lambda t, n: (t, n)),
        ),
        compiler_params=pltpu.CompilerParams(
            dimension_semantics=("parallel", "parallel"),
            vmem_limit_bytes=vmem_limit),
    )(x2, w_qkv)

    # ---- 2) Layout plumbing + normalization (XLA, fused with the transpose) ---- #
    # [B*T, 3C] -> [3, B, H, T, D]; L2-normalize each head vector ONCE here so the
    # flash kernel never re-normalizes K/V tiles; fold tau into Q so the score
    # scaling also disappears from the hot loop.  Stats in f32.
    qkv = qkv.reshape(B, T, 3, H, D).transpose(2, 0, 3, 1, 4)
    qkv32 = qkv.astype(jnp.float32)
    norm = jnp.sqrt(jnp.sum(qkv32 * qkv32, axis=-1, keepdims=True))
    qkv_n = qkv32 / (norm + eps)                      # matches torch: a/(||a||+eps)
    q = (qkv_n[0] * tau[0]).astype(x.dtype)
    k = qkv_n[1].astype(x.dtype)
    v = qkv_n[2].astype(x.dtype)

    # ---- 3) Flash-style causal cosine attention -------------------------------- #
    Tq = _pick_tile(T, 256, 8)
    Tk = _pick_tile(T, 256, 8)
    assert T % Tq == 0 and T % Tk == 0
    # TODO(synk): pad T for sequence lengths with no clean tile divisor.

    lane_dense_out = (D % 128 == 0)
    if lane_dense_out:
        out_shape = jax.ShapeDtypeStruct((B, T, C), x.dtype)
        out_spec = pl.BlockSpec((1, Tq, C), lambda b, qi, ki: (b, qi, 0))
    else:
        out_shape = jax.ShapeDtypeStruct((B, H, T, D), x.dtype)
        out_spec = pl.BlockSpec((1, H, Tq, D), lambda b, qi, ki: (b, 0, qi, 0))

    def _kv_index_map(b, qi, ki):
        # Clamp ki so fully-masked KV tiles re-use the previous block index and
        # their HBM DMA is elided (the causal @pl.when only skips compute).
        last_needed = (qi * Tq + (Tq - 1)) // Tk
        return (b, 0, jnp.minimum(ki, last_needed), 0)

    kernel = functools.partial(_flash_attn_kernel, tq=Tq, tk=Tk, head_dim=D,
                               lane_dense_out=lane_dense_out)
    out = pl.pallas_call(
        kernel,
        out_shape=out_shape,
        grid_spec=pltpu.PrefetchScalarGridSpec(
            num_scalar_prefetch=0,
            grid=(B, T // Tq, T // Tk),
            in_specs=[
                pl.BlockSpec((1, H, Tq, D), lambda b, qi, ki: (b, 0, qi, 0)),  # q
                pl.BlockSpec((1, H, Tk, D), _kv_index_map),                    # k
                pl.BlockSpec((1, H, Tk, D), _kv_index_map),                    # v
                pl.BlockSpec(memory_space=pltpu.SMEM),                         # nu
            ],
            out_specs=out_spec,
            scratch_shapes=[
                # (H, Tq, 1) keeps Tq on sublanes so broadcasts against the
                # [H, Tq, Tk] scores need no relayout; the 128-lane padding of
                # the trailing 1 only costs ~H*Tq*512 bytes.
                pltpu.VMEM((H, Tq, 1), jnp.float32),   # running max m
                pltpu.VMEM((H, Tq, 1), jnp.float32),   # running sum l
                pltpu.VMEM((H, Tq, D), jnp.float32),   # output accumulator
            ],
        ),
        compiler_params=pltpu.CompilerParams(
            dimension_semantics=("parallel", "parallel", "arbitrary"),
            vmem_limit_bytes=vmem_limit),
    )(q, k, v, nu)

    if lane_dense_out:
        return out                                     # already [B, T, C]
    # Narrow-head fallback: heads back to hidden outside the kernel.
    return out.transpose(0, 2, 1, 3).reshape(B, T, C)


# ----------------------------------------------------------------------------- #
# Pure-JAX reference                                                             #
# ----------------------------------------------------------------------------- #
def _reference(x, wq, wk, wv, tau, nu, *, num_heads, eps):
    B, T, C = x.shape
    D = C // num_heads
    q = (x @ wq).reshape(B, T, num_heads, D).transpose(0, 2, 1, 3)
    k = (x @ wk).reshape(B, T, num_heads, D).transpose(0, 2, 1, 3)
    v = (x @ wv).reshape(B, T, num_heads, D).transpose(0, 2, 1, 3)
    q = q / (jnp.linalg.norm(q, axis=-1, keepdims=True) + eps)
    k = k / (jnp.linalg.norm(k, axis=-1, keepdims=True) + eps)
    v = v / (jnp.linalg.norm(v, axis=-1, keepdims=True) + eps)
    scores = jnp.einsum("bhtd,bhsd->bhts", q, k) * tau[0]
    mask = jnp.tril(jnp.ones((T, T), dtype=bool))
    scores = jnp.where(mask, scores, -1e30)
    p = jax.nn.softmax(scores, axis=-1)
    out = jnp.einsum("bhts,bhsd->bhtd", p, v)
    return out.transpose(0, 2, 1, 3).reshape(B, T, C) * nu[0]


if __name__ == "__main__":
    eps = 1e-8
    # D = 128 exercises the lane-dense [B, T, C] output path;
    # D = 16 exercises the narrow-head fallback path.
    cases = [(2, 16, 256, 2), (2, 16, 32, 2)]

    key = jax.random.PRNGKey(0)
    for (B, T, dim, num_heads) in cases:
        key, kx, kq, kk, kv = jax.random.split(key, 5)
        x = jax.random.normal(kx, (B, T, dim), dtype=jnp.float32)
        scale = 1.0 / (dim ** 0.5)
        wq = jax.random.uniform(kq, (dim, dim), jnp.float32, -scale, scale)
        wk = jax.random.uniform(kk, (dim, dim), jnp.float32, -scale, scale)
        wv = jax.random.uniform(kv, (dim, dim), jnp.float32, -scale, scale)
        tau = jnp.full((1,), 1.5, jnp.float32)
        nu = jnp.full((1,), 0.8, jnp.float32)

        out = scaled_cosine_self_attention(x, wq, wk, wv, tau, nu,
                                           num_heads=num_heads, eps=eps)
        out = jax.block_until_ready(out)

        ref = _reference(x, wq, wk, wv, tau, nu, num_heads=num_heads, eps=eps)
        assert out.shape == (B, T, dim)
        assert jnp.allclose(out, ref, atol=1e-4, rtol=1e-4), (
            f"mismatch vs reference for dim={dim}, heads={num_heads}")

    print("KERNEL_OK")
</pallas_src>

<mosaic_0001>
module attributes {stable_mosaic.version = 11 : i64} {
  func.func @_qkv_proj_kernel(%arg0: i32, %arg1: i32, %arg2: memref<32x256xf32, #tpu.memory_space<vmem>>, %arg3: memref<256x384xf32, #tpu.memory_space<vmem>>, %arg4: memref<32x384xf32, #tpu.memory_space<vmem>>) attributes {dimension_semantics = [#tpu.dimension_semantics<parallel>, #tpu.dimension_semantics<parallel>], iteration_bounds = array<i64: 1, 2>, scalar_prefetch = 0 : i64, scratch_operands = 0 : i64, tpu.core_type = #tpu.core_type<tc>, window_params = [{transform_indices = @transform_0, window_bounds = array<i64: 32, 256>}, {transform_indices = @transform_1, window_bounds = array<i64: 256, 384>}, {transform_indices = @transform_2, window_bounds = array<i64: 32, 384>}]} {
    %c0 = arith.constant 0 : index
    %c0_0 = arith.constant 0 : index
    %0 = vector.load %arg2[%c0, %c0_0] : memref<32x256xf32, #tpu.memory_space<vmem>>, vector<32x256xf32>
    %c0_1 = arith.constant 0 : index
    %c0_2 = arith.constant 0 : index
    %1 = vector.load %arg3[%c0_1, %c0_2] : memref<256x384xf32, #tpu.memory_space<vmem>>, vector<256x384xf32>
    %cst = arith.constant dense<0.000000e+00> : vector<32x384xf32>
    %2 = tpu.matmul %0, %1, %cst {dimension_numbers = #tpu.dot_dimension_numbers<[1], [0], [0], [1], [0, 0, 1, 1], [], []>} : vector<32x256xf32>, vector<256x384xf32>, vector<32x384xf32> -> vector<32x384xf32>
    %c0_3 = arith.constant 0 : index
    %c0_4 = arith.constant 0 : index
    %3 = vector.load %arg4[%c0_3, %c0_4] : memref<32x384xf32, #tpu.memory_space<vmem>>, vector<32x384xf32>
    tpu.vector_store %arg4[%c0_3, %c0_4], %2 {strides = array<i32>} : memref<32x384xf32, #tpu.memory_space<vmem>>, vector<32x384xf32>,
    return
  }
  func.func @transform_0(%arg0: i32, %arg1: i32) -> (i32, i32) {
    %c0_i32 = arith.constant 0 : i32
    %c0_i32_0 = arith.constant 0 : i32
    return %arg0, %c0_i32 : i32, i32
  }
  func.func @transform_1(%arg0: i32, %arg1: i32) -> (i32, i32) {
    %c0_i32 = arith.constant 0 : i32
    %c0_i32_0 = arith.constant 0 : i32
    return %c0_i32, %arg1 : i32, i32
  }
  func.func @transform_2(%arg0: i32, %arg1: i32) -> (i32, i32) {
    %c0_i32 = arith.constant 0 : i32
    return %arg0, %arg1 : i32, i32
  }
}

</mosaic_0001>

<bundles_post_ra>
// kernel: tpu_custom_call.1
= control target key start
LH: loop header
LB: loop body
LE: loop exit
PB: predicated region body
PF: predicated region fallthrough
CT: control target
= control target key end

     0   :  { %7 = vsyncpa [#allocation3], 0  ;;  %s1360_s0 = inlined_call_operand.hbm [shape: f32[32,256], index: 0, kind: input, shape index: {}]   ;;  %s1361_s1 = inlined_call_operand.hbm [shape: f32[256,768], index: 1, kind: input, shape index: {}]   ;;  %s1362_s2 = inlined_call_operand.hbm [shape: f32[32,768], index: 2, kind: output, shape index: {}]  }
   0x1   :  { %8 = vsyncpa [#allocation6], 0 }
   0x2   :  { %10 = vsyncpa [#allocation6 + $0x1], 0 }
   0x3   :  { %11 = vsyncpa [#allocation4], 0 }
   0x4   :  { %13 = vsyncpa [#allocation4 + $0x1], 0  ;;  %s1018_s9 = smov 0   ;;  %s1020_s10 = smov 0  }
   0x5   :  { %s1022_s11 = smov 0   ;;  %s1024_s12 = smov 0  }
   0x6   :  { %s1026_s13 = smov 0   ;;  %s1028_s14 = smov 0  }
   0x7 LB: > { %s609_s15 = sadd.s32 4294967295, %s990_s14   ;;  %s610_s16 = sadd.s32 4294967294, %s990_s14   ;;  %s990_s14 = sphi %s1028_s14, %s19_s14   ;;  %s986_s13 = sphi %s1026_s13, %s1390_s13   ;;  %s982_s12 = sphi %s1024_s12, %s1389_s12   ;;  %s978_s11 = sphi %s1022_s11, %s1388_s11   ;;  %s974_s10 = sphi %s1020_s10, %s1387_s10   ;;  %s970_s9 = sphi %s1018_s9, %s1386_s9  }
   0x8   : > { %s64_s17 = sadd.s32 1, %s978_s11  ;;  %p71_p0 = scmp.ne.s32.totalorder %s978_s11, %s974_s10 }
   0x9   : > { %p72_p1 = scmp.eq.s32.totalorder %s990_s14, 0  ;;  %p77_p2 = scmp.ne.s32.totalorder %s974_s10, %s970_s9 }
   0xa   : > { %p1056_p3 = scmp.eq.s32.totalorder %s609_s15, 0  ;;  %p103_p4 = scmp.eq.s32.totalorder %s609_s15, 1 }
   0xb   : > { %p1060_p5 = por %p72_p1, %p71_p0  ;;  %p109_p6 = scmp.eq.s32.totalorder %s610_s16, 1 }
   0xc   : > { %s1369_s18 = scalar_select %p1056_p3, 1, 0 }
   0xd   : > { %p1066_p7 = por %p1056_p3, %p77_p2  ;;  %p1070_p8 = por %p103_p4, %p71_p0 }
   0xe   : > { %p1074_p9 = por %p109_p6, %p77_p2  ;;  %p611_p10 = scmp.ge.s32.totalorder %s990_s14, 1 }
   0xf   : > { %s1371_s20 = scalar_select %p1066_p7, 1, 0 }
  0x10   : > { %s1372_s21 = scalar_select %p1070_p8, 1, 0 }
  0x11   : > { %s1373_s22 = scalar_select %p1074_p9, 1, 0 }
  0x12   : > { %p116_p11 = scmp.lt.s32.totalorder %s990_s14, 3  ;;  %s992_s24 = smov [#allocation2]  }
  0x13   : > { %s132_s25 = sshll.u32 %s992_s24, 4  ;;  %p786_p1 = scmp.lt.s32.totalorder %s990_s14, 2  ;;  %s1084_s25 = int_to_ptr.vmem [resolvable:$true] %s132_s25 }
  0x14   : > { %p1080_p12 = pnand %p611_p10, %p116_p11  ;;  %s28_s28 = sadd.s32 1, %s986_s13 }
  0x15   : > { %p1098_p4 = pnand %p786_p1, %p1060_p5  ;;  %p1103_p6 = scmp.ge.s32.totalorder %s28_s28, 2 }
  0x16   : > { %s1374_s23 = scalar_select %p1080_p12, 1, 0 }
  0x17   : > { %p773_p13 = pneg %p1080_p12  ;;  %s846_s4 = scalar_lea.hbm %s1360_s0, 1024 }
  0x18   : > { %s1376_s27 = scalar_select %p1098_p4, 1, 0 }
  0x19   : > { %p1092_p2 = pnand %p773_p13, %p1056_p3  ;;  %p847_p10 = scmp.ne.s32.totalorder %s1360_s0, %s846_s4 }
  0x1a   : > { %s1377_s29 = scalar_select %p1103_p6, 1, 0 }
  0x1b   : > { %p848_p11 = pneg %p1092_p2  ;;  %p853_p1 = scmp.lt.u32.totalorder %s846_s4, %s1360_s0 }
  0x1d   : > { %p849_p13 = pnand %p848_p11, %p847_p10 }
  0x1f   : > { %p850_p5 = pneg %p849_p13 }
  0x21   : > { %p855_p0 = pnand %p853_p1, %p850_p5 }
  0x23   : > { %858 = shalt.err (!%p855_p0)
}
  0x24   : > { %s859_s15 = scalar_lea.vmem %s1084_s25, 1024  ;;  %p867_p3 = scmp.lt.s32.totalorder %s1084_s25, %s1084_s25 }
  0x25   : > { %p860_p9 = scmp.ne.s32.totalorder %s1084_s25, %s859_s15  ;;  %p868_p12 = scmp.lt.s32.totalorder %s859_s15, %s859_s15 }
  0x27   : > { %p862_p8 = pnand %p860_p9, %p848_p11  ;;  %p869_p4 = por %p868_p12, %p867_p3 }
  0x29   : > { %p863_p7 = pneg %p862_p8 }
  0x2b   : > { %p870_p6 = pnand %p869_p4, %p863_p7 }
  0x2d   : > { %873 = shalt.err (!%p870_p6)
}
  0x2e   : > { %s993_s16 = smov 256   ;;  %s994_s19 = smov 16  }
  0x2f   : > { %776 = dma.hbm_to_vmem [thread:$0]  (!%p1092_p2), %s1360_s0, 1024, %s1084_s25, [#allocation3], %s993_s16, %s993_s16, %s994_s19  }
  0x30   : > { %s146_s3 = sand.u32 1, %s978_s11   ;;  %p1378_p3 = scmp.ne.s32.totalorder %s1377_s29, 0 }
  0x31   : > { %s762_s4 = smul.u32 768, %s146_s3  ;;  %s1148_s16 = scalar_lea.sflag [#allocation6], %s146_s3 }
  0x32   : > { %s1392_s28 = smov (%p1378_p3, %s28_s28), 0  ;;  %s620_s6 = smul.u32 384, %s986_s13 }
  0x33   : > { %s61_s5 = ssub.s32 %s986_s13, %s1392_s28  ;;  %s150_s25 = scalar_lea.vmem [#allocation5], %s762_s4 }
  0x34   : > { %p62_p7 = scmp.eq.s32.totalorder %s61_s5, 0  ;;  %s1139_s15 = scalar_lea.hbm %s1361_s1, %s620_s6 }
  0x35   : > { %s157_s26 = sshll.u32 %s150_s25, 4  ;;  %s874_s19 = scalar_lea.hbm %s1139_s15, 12288  ;;  %s1146_s26 = int_to_ptr.vmem [resolvable:$true] %s157_s26 }
  0x36   : > { %s1144_s29 = scalar_select %p62_p7, %s978_s11, %s64_s17  }
  0x37   : > { %p875_p8 = scmp.ne.s32.totalorder %s1139_s15, %s874_s19  ;;  %p1379_p9 = scmp.ne.s32.totalorder %s1376_s27, 0 }
  0x38   : > { %s879_s4 = scalar_lea.hbm %s1361_s1, 24576  ;;  %p880_p4 = scmp.lt.u32.totalorder %s1139_s15, %s1361_s1 }
  0x39   : > { %p876_p12 = pneg %p1379_p9  ;;  %p881_p6 = scmp.lt.u32.totalorder %s879_s4, %s874_s19 }
  0x3a   : > { %p883_p11 = scmp.lt.u32.totalorder %s874_s19, %s1139_s15 }
  0x3b   : > { %p877_p0 = pnand %p876_p12, %p875_p8  ;;  %p882_p10 = por %p881_p6, %p880_p4 }
  0x3d   : > { %p878_p2 = pneg %p877_p0  ;;  %p884_p13 = por %p883_p11, %p882_p10 }
  0x3f   : > { %p885_p5 = pnand %p884_p13, %p878_p2 }
  0x41   : > { %888 = shalt.err (!%p885_p5)
}
  0x42   : > { %s889_s17 = scalar_lea.vmem %s1146_s26, 12288  ;;  %s995_s3 = smov [#allocation5]  }
  0x43   : > { %p890_p1 = scmp.ne.s32.totalorder %s1146_s26, %s889_s17  ;;  %s894_s7 = sshll.u32 %s995_s3, 4  ;;  %s895_s7 = int_to_ptr.vmem [resolvable:$false] %s894_s7 }
  0x44   : > { %s896_s8 = scalar_lea.vmem %s895_s7, 24576  ;;  %p897_p8 = scmp.lt.s32.totalorder %s1146_s26, %s895_s7 }
  0x45   : > { %p892_p3 = pnand %p890_p1, %p876_p12  ;;  %p898_p0 = scmp.lt.s32.totalorder %s896_s8, %s889_s17 }
  0x47   : > { %p893_p7 = pneg %p892_p3  ;;  %p899_p4 = por %p898_p0, %p897_p8 }
  0x49   : > { %p900_p6 = pnand %p899_p4, %p893_p7 }
  0x4b   : > { %903 = shalt.err (!%p900_p6)
}
  0x4c   : > { %s996_s25 = smov 768   ;;  %s997_s19 = smov 384  }
  0x4d   : > { %s998_s24 = smov 24   ;;  %p1380_p12 = scmp.ne.s32.totalorder %s1374_s23, 0 }
  0x4e   : > { %780 = dma.hbm_to_vmem [thread:$0]  (!%p1379_p9), %s1139_s15, 12288, %s1146_s26, %s1148_s16, %s996_s25, %s997_s19, %s998_s24  }
  0x4f   : > { %169 = sbr.rel (%p1380_p12) target bundleno = 400 (0x190), region = 28  ;;  %p1381_p2 = scmp.ne.s32.totalorder (!%p1380_p12), %s1369_s18, 0 }
  0x56   : > { %957 = dma.done.wait (%p1381_p2), [#allocation3], 1024  }
  0x57   : > { %959 = vsyncadd (%p1381_p2), [#allocation3], 4294966272  ;;  %s1183_s30 = sand.u32 1, %s974_s10   ;;  %p1382_p9 = scmp.ne.s32.totalorder %s1371_s20, 0 }
  0x58   : > { %s763_s4 = smul.u32 768, %s1183_s30  ;;  %s176_s5 = scalar_lea.sflag [#allocation6], %s1183_s30 }
  0x5a   : > { %s1187_s6 = scalar_lea.vmem [#allocation5], %s763_s4 }
  0x5b   : > { %961 = dma.done.wait (%p1382_p9), %s176_s5, 12288  }
  0x5c   : > { %963 = vsyncadd (%p1382_p9), %s176_s5, 4294955008  ;;  %v213_v0 = vld [vmem:[%s1187_s6 + $0x8] sm:$0xff]  ;;  %v216_v1 = vld [vmem:[%s1187_s6 + $0x20] sm:$0xff]  ;;  %s764_s18 = smul.u32 96, %s1183_s30  ;;  %p1383_p11 = scmp.ne.s32.totalorder %s1372_s21, 0 }
  0x5d   : > { %v212_v2 = vld [vmem:[%s1187_s6] sm:$0xff]  ;;  %v666_v3 = vpack.c.bf16 %v216_v1, %v213_v0  ;;  %v215_v4 = vld [vmem:[%s1187_s6 + $0x18] sm:$0xff]  ;;  %v222_v6 = vld [vmem:[%s1187_s6 + $0x50] sm:$0xff]  ;;  %s621_s23 = smul.u32 384, %s982_s12  ;;  %s495_s12 = scalar_lea.sflag [#allocation4], %s1183_s30 }
  0x5e   : > { %v219_v5 = vld [vmem:[%s1187_s6 + $0x38] sm:$0xff]  ;;  %v668_v7 = vpack.c.bf16 %v215_v4, %v212_v2  ;;  %v218_v9 = vld [vmem:[%s1187_s6 + $0x30] sm:$0xff]  ;;  %v221_v10 = vld [vmem:[%s1187_s6 + $0x48] sm:$0xff]  ;;  %s1290_s20 = scalar_lea.vmem [#allocation7], %s764_s18  ;;  %s999_s3 = smov [#allocation7]  }
  0x5f   : > { %v670_v8 = vpack.c.bf16 %v222_v6, %v219_v5  ;;  %v225_v11 = vld [vmem:[%s1187_s6 + $0x68] sm:$0xff]  ;;  %667 = vmatprep.subr.bf16.mxu0 %v666_v3  ;;  %v228_v12 = vld [vmem:[%s1187_s6 + $0x80] sm:$0xff]  ;;  %v672_v13 = vpack.c.bf16 %v221_v10, %v218_v9  ;;  %v227_v16 = vld [vmem:[%s1187_s6 + $0x78] sm:$0xff]  ;;  %s511_s27 = sshll.u32 %s1290_s20, 4  ;;  %s1307_s16 = scalar_lea.hbm %s1362_s2, %s621_s23  ;;  %s1309_s27 = int_to_ptr.vmem [resolvable:$true] %s511_s27 }
  0x60   : > { %669 = vmatpush1.bf16.msra.mxu0 %v668_v7  ;;  %v674_v14 = vpack.c.bf16 %v228_v12, %v225_v11  ;;  %v224_v15 = vld [vmem:[%s1187_s6 + $0x60] sm:$0xff]  ;;  %v231_v17 = vld [vmem:[%s1187_s6 + $0x98] sm:$0xff]  ;;  %v234_v18 = vld [vmem:[%s1187_s6 + $0xb0] sm:$0xff]  ;;  %s904_s17 = scalar_lea.vmem %s1309_s27, 1536  ;;  %s908_s7 = sshll.u32 %s999_s3, 4  ;;  %s909_s7 = int_to_ptr.vmem [resolvable:$false] %s908_s7 }
  0x61   : > { %671 = vmatprep.subr.bf16.mxu0 %v670_v8  ;;  %v676_v19 = vpack.c.bf16 %v227_v16, %v224_v15  ;;  %v678_v20 = vpack.c.bf16 %v234_v18, %v231_v17  ;;  %v230_v21 = vld [vmem:[%s1187_s6 + $0x90] sm:$0xff]  ;;  %v233_v22 = vld [vmem:[%s1187_s6 + $0xa8] sm:$0xff]  ;;  %v240_v24 = vld [vmem:[%s1187_s6 + $0xe0] sm:$0xff]  ;;  %p905_p10 = scmp.ne.s32.totalorder %s1309_s27, %s904_s17  ;;  %s910_s8 = scalar_lea.vmem %s909_s7, 3072 }
  0x62   : > { %v237_v23 = vld [vmem:[%s1187_s6 + $0xc8] sm:$0xff]  ;;  %v262_v25 = vld [vmem:[%s1187_s6 + $0x190] sm:$0xff]  ;;  %v680_v29 = vpack.c.bf16 %v233_v22, %v230_v21  ;;  %v236_v30 = vld [vmem:[%s1187_s6 + $0xc0] sm:$0xff]  ;;  %p911_p1 = scmp.lt.s32.totalorder %s1309_s27, %s909_s7  ;;  %p912_p3 = scmp.lt.s32.totalorder %s910_s8, %s904_s17 }
  0x63   : > { %v265_v26 = vld [vmem:[%s1187_s6 + $0x1a8] sm:$0xff]  ;;  %v214_v27 = vld [vmem:[%s1187_s6 + $0x10] sm:$0xff]  ;;  %v239_v31 = vld [vmem:[%s1187_s6 + $0xd8] sm:$0xff]  ;;  %v682_v34 = vpack.c.bf16 %v240_v24, %v237_v23  ;;  %p906_p13 = pnand %p905_p10, %p1383_p11 }
  0x64   : > { %673 = vmatpush1.bf16.msra.mxu0 %v672_v13  ;;  %v217_v28 = vld [vmem:[%s1187_s6 + $0x28] sm:$0xff]  ;;  %v730_v32 = vpack.c.bf16 %v265_v26, %v262_v25  ;;  %v243_v35 = vld [vmem:[%s1187_s6 + $0xf8] sm:$0xff]  ;;  %v268_v36 = vld [vmem:[%s1187_s6 + $0x1c0] sm:$0xff]  ;;  %v684_v43 = vpack.c.bf16 %v239_v31, %v236_v30  ;;  %p913_p7 = por %p912_p3, %p911_p1 }
  0x65   : > { %675 = vmatprep.subr.bf16.mxu0 %v674_v14  ;;  %v732_v33 = vpack.c.bf16 %v217_v28, %v214_v27  ;;  %v271_v37 = vld [vmem:[%s1187_s6 + $0x1d8] sm:$0xff]  ;;  %v246_v38 = vld [vmem:[%s1187_s6 + $0x110] sm:$0xff]  ;;  %v220_v40 = vld [vmem:[%s1187_s6 + $0x40] sm:$0xff]  ;;  %p907_p5 = pneg %p906_p13 }
  0x66   : > { %731 = vmatprep.subr.bf16.mxu1 %v730_v32  ;;  %v734_v39 = vpack.c.bf16 %v271_v37, %v268_v36  ;;  %v223_v41 = vld [vmem:[%s1187_s6 + $0x58] sm:$0xff]  ;;  %v274_v44 = vld [vmem:[%s1187_s6 + $0x1f0] sm:$0xff]  ;;  %v277_v45 = vld [vmem:[%s1187_s6 + $0x208] sm:$0xff]  ;;  %v686_v47 = vpack.c.bf16 %v246_v38, %v243_v35 }
  0x67   : > { %733 = vmatpush3.bf16.msra.mxu1 %v732_v33  ;;  %v736_v42 = vpack.c.bf16 %v223_v41, %v220_v40  ;;  %v226_v46 = vld [vmem:[%s1187_s6 + $0x70] sm:$0xff]  ;;  %v245_v49 = vld [vmem:[%s1187_s6 + $0x108] sm:$0xff]  ;;  %v738_v50 = vpack.c.bf16 %v277_v45, %v274_v44  ;;  %v252_v53 = vld [vmem:[%s1187_s6 + $0x140] sm:$0xff]  ;;  %p914_p8 = pnand %p913_p7, %p907_p5 }
  0x68   : > { %677 = vmatpush1.bf16.msra.mxu0 %v676_v19  ;;  %735 = vmatprep.subr.bf16.mxu1 %v734_v39  ;;  %v242_v48 = vld [vmem:[%s1187_s6 + $0xf0] sm:$0xff]  ;;  %v229_v51 = vld [vmem:[%s1187_s6 + $0x88] sm:$0xff]  ;;  %v280_v54 = vld [vmem:[%s1187_s6 + $0x220] sm:$0xff] }
  0x69   : > { %679 = vmatprep.subr.bf16.mxu0 %v678_v20  ;;  %v249_v52 = vld [vmem:[%s1187_s6 + $0x128] sm:$0xff]  ;;  %v740_v55 = vpack.c.bf16 %v229_v51, %v226_v46  ;;  %v283_v56 = vld [vmem:[%s1187_s6 + $0x238] sm:$0xff]  ;;  %v688_v57 = vpack.c.bf16 %v245_v49, %v242_v48  ;;  %v248_v58 = vld [vmem:[%s1187_s6 + $0x120] sm:$0xff] }
  0x6a   : > { %v742_v59 = vpack.c.bf16 %v283_v56, %v280_v54  ;;  %v232_v60 = vld [vmem:[%s1187_s6 + $0xa0] sm:$0xff]  ;;  %v235_v61 = vld [vmem:[%s1187_s6 + $0xb8] sm:$0xff]  ;;  %v690_v62 = vpack.c.bf16 %v252_v53, %v249_v52  ;;  %v286_v0 = vld [vmem:[%s1187_s6 + $0x250] sm:$0xff] }
  0x6b   : > { %737 = vmatpush3.bf16.msra.mxu1 %v736_v42  ;;  %v251_v63 = vld [vmem:[%s1187_s6 + $0x138] sm:$0xff]  ;;  %v289_v1 = vld [vmem:[%s1187_s6 + $0x268] sm:$0xff]  ;;  %v258_v3 = vld [vmem:[%s1187_s6 + $0x170] sm:$0xff]  ;;  %v744_v4 = vpack.c.bf16 %v235_v61, %v232_v60 }
  0x6c   : > { %681 = vmatpush1.bf16.msra.mxu0 %v680_v29  ;;  %739 = vmatprep.subr.bf16.mxu1 %v738_v50  ;;  %v255_v2 = vld [vmem:[%s1187_s6 + $0x158] sm:$0xff]  ;;  %v692_v5 = vpack.c.bf16 %v251_v63, %v248_v58  ;;  %v254_v6 = vld [vmem:[%s1187_s6 + $0x150] sm:$0xff]  ;;  %v746_v7 = vpack.c.bf16 %v289_v1, %v286_v0  ;;  %v241_v9 = vld [vmem:[%s1187_s6 + $0xe8] sm:$0xff] }
  0x6d   : > { %683 = vmatprep.subr.bf16.mxu0 %v682_v34  ;;  %v238_v8 = vld [vmem:[%s1187_s6 + $0xd0] sm:$0xff]  ;;  %v694_v10 = vpack.c.bf16 %v258_v3, %v255_v2  ;;  %v257_v11 = vld [vmem:[%s1187_s6 + $0x168] sm:$0xff]  ;;  %v292_v12 = vld [vmem:[%s1187_s6 + $0x280] sm:$0xff] }
  0x6e   : > { %v295_v13 = vld [vmem:[%s1187_s6 + $0x298] sm:$0xff]  ;;  %v261_v14 = vld [vmem:[%s1187_s6 + $0x188] sm:$0xff]  ;;  %v264_v15 = vld [vmem:[%s1187_s6 + $0x1a0] sm:$0xff]  ;;  %v748_v16 = vpack.c.bf16 %v241_v9, %v238_v8  ;;  %v696_v17 = vpack.c.bf16 %v257_v11, %v254_v6 }
  0x6f   : > { %741 = vmatpush3.bf16.msra.mxu1 %v740_v55  ;;  %v260_v18 = vld [vmem:[%s1187_s6 + $0x180] sm:$0xff]  ;;  %v750_v19 = vpack.c.bf16 %v295_v13, %v292_v12  ;;  %v247_v21 = vld [vmem:[%s1187_s6 + $0x118] sm:$0xff]  ;;  %v698_v22 = vpack.c.bf16 %v264_v15, %v261_v14  ;;  %v298_v24 = vld [vmem:[%s1187_s6 + $0x2b0] sm:$0xff] }
  0x70   : > { %685 = vmatpush1.bf16.msra.mxu0 %v684_v43  ;;  %743 = vmatprep.subr.bf16.mxu1 %v742_v59  ;;  %v244_v20 = vld [vmem:[%s1187_s6 + $0x100] sm:$0xff]  ;;  %v263_v23 = vld [vmem:[%s1187_s6 + $0x198] sm:$0xff]  ;;  %v301_v25 = vld [vmem:[%s1187_s6 + $0x2c8] sm:$0xff] }
  0x71   : > { %687 = vmatprep.subr.bf16.mxu0 %v686_v47  ;;  %v267_v26 = vld [vmem:[%s1187_s6 + $0x1b8] sm:$0xff]  ;;  %v270_v27 = vld [vmem:[%s1187_s6 + $0x1d0] sm:$0xff]  ;;  %v752_v28 = vpack.c.bf16 %v247_v21, %v244_v20  ;;  %v205_v29 = vld [vmem:[#allocation2 + $0x8] sm:$0xff]  ;;  %v700_v30 = vpack.c.bf16 %v263_v23, %v260_v18  ;;  %v754_v32 = vpack.c.bf16 %v301_v25, %v298_v24 }
  0x72   : > { %v266_v31 = vld [vmem:[%s1187_s6 + $0x1b0] sm:$0xff]  ;;  %v253_v34 = vld [vmem:[%s1187_s6 + $0x148] sm:$0xff]  ;;  %v702_v35 = vpack.c.bf16 %v270_v27, %v267_v26  ;;  %v304_v37 = vld [vmem:[%s1187_s6 + $0x2e0] sm:$0xff]  ;;  %461 = vmatprep.mubr.f32.mxu1 %v205_v29  ;;  %372 = vmatprep.mubr.f32.mxu0 %v205_v29 }
  0x73   : > { %745 = vmatpush3.bf16.msra.mxu1 %v744_v4  ;;  %v250_v33 = vld [vmem:[%s1187_s6 + $0x130] sm:$0xff]  ;;  %v269_v36 = vld [vmem:[%s1187_s6 + $0x1c8] sm:$0xff]  ;;  %v307_v38 = vld [vmem:[%s1187_s6 + $0x2f8] sm:$0xff] }
  0x74   : > { %689 = vmatpush1.bf16.msra.mxu0 %v688_v57  ;;  %747 = vmatprep.subr.bf16.mxu1 %v746_v7  ;;  %v273_v39 = vld [vmem:[%s1187_s6 + $0x1e8] sm:$0xff]  ;;  %v276_v40 = vld [vmem:[%s1187_s6 + $0x200] sm:$0xff]  ;;  %v756_v41 = vpack.c.bf16 %v253_v34, %v250_v33  ;;  %v704_v42 = vpack.c.bf16 %v269_v36, %v266_v31  ;;  %v758_v43 = vpack.c.bf16 %v307_v38, %v304_v37  ;;  %v259_v45 = vld [vmem:[%s1187_s6 + $0x178] sm:$0xff] }
  0x75   : > { %691 = vmatprep.subr.bf16.mxu0 %v690_v62  ;;  %v256_v44 = vld [vmem:[%s1187_s6 + $0x160] sm:$0xff]  ;;  %v706_v46 = vpack.c.bf16 %v276_v40, %v273_v39  ;;  %v275_v48 = vld [vmem:[%s1187_s6 + $0x1f8] sm:$0xff]  ;;  %v282_v50 = vld [vmem:[%s1187_s6 + $0x230] sm:$0xff] }
  0x76   : > { %v272_v47 = vld [vmem:[%s1187_s6 + $0x1e0] sm:$0xff]  ;;  %v279_v49 = vld [vmem:[%s1187_s6 + $0x218] sm:$0xff]  ;;  %v760_v51 = vpack.c.bf16 %v259_v45, %v256_v44  ;;  %v278_v54 = vld [vmem:[%s1187_s6 + $0x210] sm:$0xff] }
  0x77   : > { %749 = vmatpush3.bf16.msra.mxu1 %v748_v16  ;;  %v708_v52 = vpack.c.bf16 %v275_v48, %v272_v47  ;;  %v710_v53 = vpack.c.bf16 %v282_v50, %v279_v49  ;;  %v281_v55 = vld [vmem:[%s1187_s6 + $0x228] sm:$0xff]  ;;  %v288_v57 = vld [vmem:[%s1187_s6 + $0x260] sm:$0xff]  ;;  %v207_v60 = vld [vmem:[#allocation2 + $0x18] sm:$0xff] }
  0x78   : > { %693 = vmatpush1.bf16.msra.mxu0 %v692_v5  ;;  %751 = vmatprep.subr.bf16.mxu1 %v750_v19  ;;  %v285_v56 = vld [vmem:[%s1187_s6 + $0x248] sm:$0xff]  ;;  %v204_v58 = vld [vmem:[#allocation2] sm:$0xff]  ;;  %v712_v59 = vpack.c.bf16 %v281_v55, %v278_v54  ;;  %v287_v63 = vld [vmem:[%s1187_s6 + $0x258] sm:$0xff] }
  0x79   : > { %695 = vmatprep.subr.bf16.mxu0 %v694_v10  ;;  %v714_v61 = vpack.c.bf16 %v288_v57, %v285_v56  ;;  %v284_v62 = vld [vmem:[%s1187_s6 + $0x240] sm:$0xff]  ;;  %v291_v0 = vld [vmem:[%s1187_s6 + $0x278] sm:$0xff]  ;;  %v294_v1 = vld [vmem:[%s1187_s6 + $0x290] sm:$0xff] }
  0x7a   : > { %v206_v2 = vld [vmem:[#allocation2 + $0x10] sm:$0xff]  ;;  %v716_v3 = vpack.c.bf16 %v287_v63, %v284_v62  ;;  %v209_v4 = vld [vmem:[#allocation2 + $0x28] sm:$0xff]  ;;  %v718_v5 = vpack.c.bf16 %v294_v1, %v291_v0  ;;  %v300_v9 = vld [vmem:[%s1187_s6 + $0x2c0] sm:$0xff] }
  0x7b   : > { %753 = vmatpush3.bf16.msra.mxu1 %v752_v28  ;;  %v290_v6 = vld [vmem:[%s1187_s6 + $0x270] sm:$0xff]  ;;  %v293_v7 = vld [vmem:[%s1187_s6 + $0x288] sm:$0xff]  ;;  %v208_v10 = vld [vmem:[#allocation2 + $0x20] sm:$0xff] }
  0x7c   : > { %697 = vmatpush1.bf16.msra.mxu0 %v696_v17  ;;  %755 = vmatprep.subr.bf16.mxu1 %v754_v32  ;;  %v297_v8 = vld [vmem:[%s1187_s6 + $0x2a8] sm:$0xff]  ;;  %v720_v11 = vpack.c.bf16 %v293_v7, %v290_v6  ;;  %v211_v12 = vld [vmem:[#allocation2 + $0x38] sm:$0xff]  ;;  %v296_v14 = vld [vmem:[%s1187_s6 + $0x2a0] sm:$0xff] }
  0x7d   : > { %699 = vmatprep.subr.bf16.mxu0 %v698_v22  ;;  %v722_v13 = vpack.c.bf16 %v300_v9, %v297_v8  ;;  %v299_v15 = vld [vmem:[%s1187_s6 + $0x2b8] sm:$0xff]  ;;  %v306_v17 = vld [vmem:[%s1187_s6 + $0x2f0] sm:$0xff]  ;;  %v305_v22 = vld [vmem:[%s1187_s6 + $0x2e8] sm:$0xff] }
  0x7e   : > { %v303_v16 = vld [vmem:[%s1187_s6 + $0x2d8] sm:$0xff]  ;;  %v210_v18 = vld [vmem:[#allocation2 + $0x30] sm:$0xff]  ;;  %v724_v19 = vpack.c.bf16 %v299_v15, %v296_v14 }
  0x7f   : > { %757 = vmatpush3.bf16.msra.mxu1 %v756_v41  ;;  %v726_v20 = vpack.c.bf16 %v306_v17, %v303_v16  ;;  %v302_v21 = vld [vmem:[%s1187_s6 + $0x2d0] sm:$0xff] }
  0x80   : > { %701 = vmatpush1.bf16.msra.mxu0 %v700_v30  ;;  %759 = vmatprep.subr.bf16.mxu1 %v758_v43  ;;  %v728_v23 = vpack.c.bf16 %v305_v22, %v302_v21 }
  0x81   : > { %703 = vmatprep.subr.bf16.mxu0 %v702_v35 }
  0x83   : > { %761 = vmatpush3.bf16.msra.mxu1 %v760_v51 }
  0x84   : > { %705 = vmatpush1.bf16.msra.mxu0 %v704_v42 }
  0x85   : > { %707 = vmatprep.subr.bf16.mxu0 %v706_v46 }
  0x86   : > { %462 = vmatmul.mubr.f32.vlgmr.msra.gmra.mrb[0].mxu1 %v204_v58 }
  0x87   : > { %466 = vmatprep.mubr.f32.mxu1 %v207_v60 }
  0x88   : > { %709 = vmatpush1.bf16.msra.mxu0 %v708_v52 }
  0x89   : > { %711 = vmatprep.subr.bf16.mxu0 %v710_v53 }
  0x8a   : > { %467 = vmatmul.mubr.f32.gmra.mrb[2].mxu1 %v206_v2 }
  0x8b   : > { %471 = vmatprep.mubr.f32.mxu1 %v209_v4 }
  0x8c   : > { %713 = vmatpush1.bf16.msra.mxu0 %v712_v59 }
  0x8d   : > { %715 = vmatprep.subr.bf16.mxu0 %v714_v61 }
  0x8e   : > { %472 = vmatmul.mubr.f32.gmra.mrb[4].mxu1 %v208_v10 }
  0x8f   : > { %476 = vmatprep.mubr.f32.mxu1 %v211_v12 }
  0x90   : > { %717 = vmatpush1.bf16.msra.mxu0 %v716_v3 }
  0x91   : > { %719 = vmatprep.subr.bf16.mxu0 %v718_v5 }
  0x92   : > { %477 = vmatmul.mubr.f32.gmra.mrb[6].mxu1 %v210_v18 }
  0x94   : > { %721 = vmatpush1.bf16.msra.mxu0 %v720_v11 }
  0x95   : > { %723 = vmatprep.subr.bf16.mxu0 %v722_v13 }
  0x98   : > { %725 = vmatpush1.bf16.msra.mxu0 %v724_v19 }
  0x99   : > { %727 = vmatprep.subr.bf16.mxu0 %v726_v20 }
  0x9c   : > { %729 = vmatpush1.bf16.msra.mxu0 %v728_v23 }
  0x9f   : > { %373 = vmatmul.mubr.f32.vlgmr.msra.gmra.mrb[0].mxu0 %v204_v58 }
  0xa0   : > { %378 = vmatprep.mubr.f32.mxu0 %v207_v60 }
  0xa3   : > { %379 = vmatmul.mubr.f32.gmra.mrb[2].mxu0 %v206_v2 }
  0xa4   : > { %384 = vmatprep.mubr.f32.mxu0 %v209_v4 }
  0xa7   : > { %385 = vmatmul.mubr.f32.gmra.mrb[4].mxu0 %v208_v10 }
  0xa8   : > { %390 = vmatprep.mubr.f32.mxu0 %v211_v12 }
  0xab   : > { %391 = vmatmul.mubr.f32.gmra.mrb[6].mxu0 %v210_v18 }
 0x159   : > { %v654_v24 = vpop.f32.mrb[0].mxu1 }
 0x15a   : > { %v655_v25 = vpop.f32.mrb[1].mxu1 }
 0x15b   : > { %v656_v26 = vadd.f32 %v655_v25, %v654_v24 }
 0x15d   : > { %484 = vst [vmem:[%s1290_s20 + $0x10] sm:$0xff] %v656_v26  ;;  %v657_v27 = vpop.f32.mrb[2].mxu1 }
 0x15e   : > { %v658_v28 = vpop.f32.mrb[3].mxu1 }
 0x15f   : > { %v659_v29 = vadd.f32 %v658_v28, %v657_v27 }
 0x161   : > { %487 = vst [vmem:[%s1290_s20 + $0x28] sm:$0xff] %v659_v29  ;;  %v660_v30 = vpop.f32.mrb[4].mxu1 }
 0x162   : > { %v661_v31 = vpop.f32.mrb[5].mxu1 }
 0x163   : > { %v662_v32 = vadd.f32 %v661_v31, %v660_v30 }
 0x165   : > { %490 = vst [vmem:[%s1290_s20 + $0x40] sm:$0xff] %v662_v32  ;;  %v663_v33 = vpop.f32.mrb[6].mxu1 }
 0x166   : > { %v664_v34 = vpop.f32.mrb[7].mxu1 }
 0x167   : > { %v665_v35 = vadd.f32 %v664_v34, %v663_v33 }
 0x169   : > { %493 = vst [vmem:[%s1290_s20 + $0x58] sm:$0xff] %v665_v35 }
 0x172   : > { %v374_v36 = vpop.f32.mrb[0].mxu0 }
 0x173   : > { %482 = vst [vmem:[%s1290_s20] sm:$0xff] %v374_v36  ;;  %v376_v37 = vpop.f32.mrb[1].mxu0 }
 0x174   : > { %483 = vst [vmem:[%s1290_s20 + $0x8] sm:$0xff] %v376_v37 }
 0x176   : > { %v380_v38 = vpop.f32.mrb[2].mxu0 }
 0x177   : > { %485 = vst [vmem:[%s1290_s20 + $0x18] sm:$0xff] %v380_v38  ;;  %v382_v39 = vpop.f32.mrb[3].mxu0 }
 0x178   : > { %486 = vst [vmem:[%s1290_s20 + $0x20] sm:$0xff] %v382_v39 }
 0x17a   : > { %v386_v40 = vpop.f32.mrb[4].mxu0 }
 0x17b   : > { %488 = vst [vmem:[%s1290_s20 + $0x30] sm:$0xff] %v386_v40  ;;  %v388_v41 = vpop.f32.mrb[5].mxu0 }
 0x17c   : > { %489 = vst [vmem:[%s1290_s20 + $0x38] sm:$0xff] %v388_v41 }
 0x17e   : > { %v392_v42 = vpop.f32.mrb[6].mxu0 }
 0x17f   : > { %491 = vst [vmem:[%s1290_s20 + $0x48] sm:$0xff] %v392_v42  ;;  %v394_v43 = vpop.f32.mrb[7].mxu0 }
 0x180   : > { %492 = vst [vmem:[%s1290_s20 + $0x50] sm:$0xff] %v394_v43 }
 0x181   : > { %917 = shalt.err (!%p914_p8)
}
 0x182   : > { %s918_s25 = scalar_lea.hbm %s1307_s16, 1536  ;;  %s922_s4 = scalar_lea.hbm %s1362_s2, 3072 }
 0x183   : > { %p919_p0 = scmp.ne.s32.totalorder %s1307_s16, %s918_s25  ;;  %p923_p12 = scmp.lt.u32.totalorder %s1307_s16, %s1362_s2 }
 0x184   : > { %p924_p2 = scmp.lt.u32.totalorder %s922_s4, %s918_s25  ;;  %p926_p10 = scmp.lt.u32.totalorder %s918_s25, %s1307_s16 }
 0x185   : > { %p920_p4 = pnand %p919_p0, %p1383_p11 }
 0x186   : > { %p925_p9 = por %p924_p2, %p923_p12 }
 0x187   : > { %p921_p6 = pneg %p920_p4 }
 0x188   : > { %p927_p13 = por %p926_p10, %p925_p9 }
 0x18a   : > { %p928_p5 = pnand %p927_p13, %p921_p6 }
 0x18c   : > { %931 = shalt.err (!%p928_p5)
}
 0x18d   : > { %s1000_s18 = smov 384   ;;  %s1001_s20 = smov 768  }
 0x18e   : > { %s1002_s23 = smov 24  }
 0x18f   : > { %771 = dma.vmem_to_hbm [thread:$0]  (%p1383_p11), %s1309_s27, 1536, %s1307_s16, %s495_s12, %s1000_s18, %s1001_s20, %s1002_s23  }
 0x190 PF: > { %s526_s15 = sand.u32 1, %s970_s9   ;;  %p1384_p1 = scmp.ne.s32.totalorder %s1373_s22, 0 }
 0x191   : > { %p1385_p3 = scmp.ge.s32.totalorder %s990_s14, 2  ;;  %s527_s26 = scalar_lea.sflag [#allocation4], %s526_s15 }
 0x193   : > { %p782_p7 = pnand %p1385_p3, %p1384_p1 }
 0x195   : > { %965 = dma.done.wait (!%p782_p7), %s527_s26, 1536  }
 0x196   : > { %967 = vsyncadd (!%p782_p7), %s527_s26, 4294965760  ;;  %s19_s14 = sadd.s32 1, %s990_s14   ;;  %s1386_s9 = smov %s974_s10 }
 0x197   : > { %p16_p8 = scmp.ge.s32.totalorder %s19_s14, 4   ;;  %s1387_s10 = smov %s978_s11 }
 0x198   : > { %s1388_s11 = smov %s1144_s29  ;;  %s1389_s12 = smov %s986_s13 }
 0x199   : > { %s1390_s13 = smov %s1392_s28  ;;  %18 = sbr.rel (!%p16_p8) target bundleno = 7 (0x7), region = 79 }
 0x1a0   :  { %532 = vsyncpa [#allocation3], 1 }
 0x1a1   :  { %534 = vsyncpa [#allocation3 + $0x1], 1 }
 0x1a2   :  { %535 = vsyncpa [#allocation6], 1 }
 0x1a3   :  { %537 = vsyncpa [#allocation6 + $0x1], 1 }
 0x1a4   :  { %538 = vsyncpa [#allocation4], 1 }
 0x1a5   :  { %540 = vsyncpa [#allocation4 + $0x1], 1 }

</bundles_post_ra>
